<compile_context>
chip_gen: v7x
topology: tpu7x:2x2x1
jax: 0.10.0
libtpu: 0.0.40
codegen_flags: <defaults>
</compile_context>

<pallas_src>
import functools

import jax
import jax.numpy as jnp
from jax.experimental import pallas as pl
from jax.experimental.pallas import tpu as pltpu

EPS = 1e-5

# Modest scoped-VMEM raise: above the 16/32 MiB defaults (v5e/v6e) but safely
# below v7x's 64 MiB physical per-core VMEM, so the same tile sizes compile on
# all generations while leaving double-buffering headroom.
_VMEM_LIMIT_BYTES = 48 * 1024 * 1024

_COMPILER_PARAMS = pltpu.CompilerParams(
    dimension_semantics=("parallel",),
    vmem_limit_bytes=_VMEM_LIMIT_BYTES,
)


def _pick_tile_m(m, requested=None):
    """Largest convenient row tile (multiple of 8) that divides m."""
    if requested is not None and m % requested == 0 and requested % 8 == 0:
        return requested
    for cand in (2048, 1024, 512, 256, 128, 64, 32, 16, 8):
        if m % cand == 0:
            return cand
    return m  # fall back to the full dimension (always a legal block shape)


# ---------------------------------------------------------------------------
# Pass 1: conv-as-matmul (single K = 9*Cin contraction) + per-tile BN partials
# ---------------------------------------------------------------------------
def _conv_stats_kernel(p_ref, w_ref, y_ref, psum_ref, psumsq_ref):
    # One M-tile: (TILE_M, 9*Cin) @ (9*Cin, Cout) in a single MXU contraction.
    acc = jnp.dot(p_ref[...], w_ref[...], preferred_element_type=jnp.float32)
    y_ref[...] = acc
    # Per-tile, per-channel partial statistics for exact batch-norm stats.
    psum_ref[0] = jnp.sum(acc, axis=0, keepdims=True)
    psumsq_ref[0] = jnp.sum(acc * acc, axis=0, keepdims=True)


def _conv3x3_with_stats(patches, wk, cout, tile_m):
    m, k = patches.shape
    nt = m // tile_m
    return pl.pallas_call(
        _conv_stats_kernel,
        out_shape=(
            jax.ShapeDtypeStruct((m, cout), jnp.float32),      # conv output
            jax.ShapeDtypeStruct((nt, 1, cout), jnp.float32),  # partial sums
            jax.ShapeDtypeStruct((nt, 1, cout), jnp.float32),  # partial sumsq
        ),
        grid_spec=pltpu.PrefetchScalarGridSpec(
            num_scalar_prefetch=0,
            grid=(nt,),
            in_specs=[
                pl.BlockSpec((tile_m, k), lambda i: (i, 0)),  # patch row tile
                pl.BlockSpec((k, cout), lambda i: (0, 0)),    # weights (resident)
            ],
            out_specs=[
                pl.BlockSpec((tile_m, cout), lambda i: (i, 0)),
                pl.BlockSpec((1, 1, cout), lambda i: (i, 0, 0)),
                pl.BlockSpec((1, 1, cout), lambda i: (i, 0, 0)),
            ],
        ),
        compiler_params=_COMPILER_PARAMS,
    )(patches, wk)


# ---------------------------------------------------------------------------
# Pass 2: BN affine apply (+ optional residual) + ReLU, lane-dense blocking
# ---------------------------------------------------------------------------
def _bn_res_relu_kernel(y_ref, a_ref, c_ref, r_ref, o_ref):
    v = y_ref[...] * a_ref[...] + c_ref[...] + r_ref[...].astype(jnp.float32)
    o_ref[...] = jnp.maximum(v, 0.0).astype(o_ref.dtype)


def _bn_relu_kernel(y_ref, a_ref, c_ref, o_ref):
    v = y_ref[...] * a_ref[...] + c_ref[...]
    o_ref[...] = jnp.maximum(v, 0.0).astype(o_ref.dtype)


def _apply_bn_relu(conv_out, scale, shift, residual_flat, out_dtype):
    m, cout = conv_out.shape

    # Lane-dense re-blocking: view (M, Cout) as (M/k, k*Cout) so the last dim
    # fills whole 128-lane vregs (unmasked vst) when Cout < 128.  This is a
    # pure metadata reshape; per-channel scale/shift are tiled k times.
    fold = 1
    if cout < 128 and 128 % cout == 0 and m % (128 // cout) == 0:
        fold = 128 // cout
    m2, c2 = m // fold, cout * fold

    y = conv_out.reshape(m2, c2)
    a = jnp.tile(scale.reshape(1, cout), (1, fold))
    c = jnp.tile(shift.reshape(1, cout), (1, fold))

    tile_m = _pick_tile_m(m2)
    nt = m2 // tile_m

    row_spec = pl.BlockSpec((tile_m, c2), lambda i: (i, 0))
    vec_spec = pl.BlockSpec((1, c2), lambda i: (0, 0))

    if residual_flat is None:
        out = pl.pallas_call(
            _bn_relu_kernel,
            out_shape=jax.ShapeDtypeStruct((m2, c2), out_dtype),
            grid_spec=pltpu.PrefetchScalarGridSpec(
                num_scalar_prefetch=0,
                grid=(nt,),
                in_specs=[row_spec, vec_spec, vec_spec],
                out_specs=row_spec,
            ),
            compiler_params=_COMPILER_PARAMS,
        )(y, a, c)
    else:
        r = residual_flat.reshape(m2, c2)
        out = pl.pallas_call(
            _bn_res_relu_kernel,
            out_shape=jax.ShapeDtypeStruct((m2, c2), out_dtype),
            grid_spec=pltpu.PrefetchScalarGridSpec(
                num_scalar_prefetch=0,
                grid=(nt,),
                in_specs=[row_spec, vec_spec, vec_spec, row_spec],
                out_specs=row_spec,
            ),
            compiler_params=_COMPILER_PARAMS,
        )(y, a, c, r)
    return out.reshape(m, cout)


# ---------------------------------------------------------------------------
# Wrapper glue
# ---------------------------------------------------------------------------
def _im2col(x_nhwc):
    """(N,H,W,C) -> (N*H*W, 9*C): the nine 3x3 taps concatenated per pixel."""
    # TODO(synk): replace this XLA-side im2col materialization with halo'd
    # row-tile DMAs inside the conv kernel to avoid ~9x HBM read amplification.
    n, h, w, c = x_nhwc.shape
    xp = jnp.pad(x_nhwc, ((0, 0), (1, 1), (1, 1), (0, 0)))
    taps = [xp[:, kh:kh + h, kw:kw + w, :] for kh in range(3) for kw in range(3)]
    return jnp.concatenate(taps, axis=-1).reshape(n * h * w, 9 * c)


def conv3x3_bn_relu(x_nhwc, w_oihw, gamma, beta, residual_flat=None, tile_m=None):
    """conv3x3(stride=1, pad=1, bias=False) -> BatchNorm2d(batch stats)
    -> (+ optional residual) -> ReLU, on NHWC input."""
    n, h, w, cin = x_nhwc.shape
    cout = w_oihw.shape[0]
    m = n * h * w
    k = 9 * cin

    patches = _im2col(x_nhwc).astype(jnp.float32)
    # OIHW -> (kh, kw, in, out) -> (9*Cin, Cout); ordering matches _im2col.
    wk = jnp.transpose(w_oihw, (2, 3, 1, 0)).reshape(k, cout).astype(jnp.float32)

    tm = _pick_tile_m(m, tile_m)
    conv_out, psum, psumsq = _conv3x3_with_stats(patches, wk, cout, tm)

    # Tiny cross-tile reduction + BN affine folding (exact batch statistics,
    # biased variance as in PyTorch training-mode BatchNorm2d normalization).
    total = jnp.sum(psum, axis=(0, 1))        # (Cout,)
    total_sq = jnp.sum(psumsq, axis=(0, 1))   # (Cout,)
    mean = total / m
    var = total_sq / m - mean * mean
    inv = jax.lax.rsqrt(var + EPS)
    scale = gamma.astype(jnp.float32) * inv
    shift = beta.astype(jnp.float32) - mean * scale

    out_flat = _apply_bn_relu(conv_out, scale, shift, residual_flat, x_nhwc.dtype)
    return out_flat.reshape(n, h, w, cout)


def basic_block_forward(x_nchw, params, tile_m=None):
    """BasicBlock.forward with stride=1, expansion=1, groups=1,
    downsample=None, residual_block=None, dropout=0 (identity)."""
    x = jnp.transpose(x_nchw, (0, 2, 3, 1))  # NCHW -> NHWC
    n, h, w, c = x.shape

    # conv1 -> bn1 -> relu     (dropout p=0 is identity; no residual streamed)
    h1 = conv3x3_bn_relu(x, params["w1"], params["g1"], params["b1"],
                         residual_flat=None, tile_m=tile_m)

    # conv2 -> bn2 -> + identity residual -> relu
    res_flat = x.reshape(n * h * w, c)
    o = conv3x3_bn_relu(h1, params["w2"], params["g2"], params["b2"],
                        residual_flat=res_flat, tile_m=tile_m)

    return jnp.transpose(o, (0, 3, 1, 2))  # NHWC -> NCHW


def _ref_forward(x_nchw, params):
    """Pure-JAX reference mirroring the PyTorch forward (for validation)."""
    def conv(x, w):
        return jax.lax.conv_general_dilated(
            x, w, window_strides=(1, 1), padding=((1, 1), (1, 1)),
            dimension_numbers=("NCHW", "OIHW", "NCHW"))

    def bn(x, g, b):
        mean = jnp.mean(x, axis=(0, 2, 3), keepdims=True)
        var = jnp.mean((x - mean) ** 2, axis=(0, 2, 3), keepdims=True)
        return ((x - mean) * jax.lax.rsqrt(var + EPS)
                * g.reshape(1, -1, 1, 1) + b.reshape(1, -1, 1, 1))

    h = jax.nn.relu(bn(conv(x_nchw, params["w1"]), params["g1"], params["b1"]))
    o = bn(conv(h, params["w2"]), params["g2"], params["b2"]) + x_nchw
    return jax.nn.relu(o)


if __name__ == "__main__":
    key = jax.random.PRNGKey(0)
    k1, k2, k3, k4, k5 = jax.random.split(key, 5)

    # inplanes == planes (expansion=1, stride=1, no downsample -> identity residual)
    N, C, H, W = 2, 32, 16, 16          # M = N*H*W = 512 pixel rows
    inplanes = planes = C

    x = jax.random.normal(k1, (N, C, H, W), jnp.float32)
    params = {
        "w1": 0.1 * jax.random.normal(k2, (planes, inplanes, 3, 3), jnp.float32),
        "g1": 1.0 + 0.1 * jax.random.normal(k3, (planes,), jnp.float32),
        "b1": 0.1 * jax.random.normal(k4, (planes,), jnp.float32),
        "w2": 0.1 * jax.random.normal(k5, (planes, planes, 3, 3), jnp.float32),
        "g2": jnp.ones((planes,), jnp.float32),
        "b2": jnp.zeros((planes,), jnp.float32),
    }

    # tile_m=128 -> 4 M-tiles per conv stage: exercises the tiled pipeline and
    # the two-pass (partial-stat) BatchNorm path.
    fwd = jax.jit(functools.partial(basic_block_forward, tile_m=128))
    out = jax.block_until_ready(fwd(x, params))

    ref = _ref_forward(x, params)
    assert out.shape == (N, C, H, W), out.shape
    max_err = float(jnp.max(jnp.abs(out - ref)))
    assert jnp.allclose(out, ref, atol=1e-3, rtol=1e-3), f"max abs err {max_err}"

    print("KERNEL_OK")
</pallas_src>

<mosaic_0001>
module attributes {stable_mosaic.version = 11 : i64} {
  func.func @_conv_stats_kernel(%arg0: i32, %arg1: memref<128x288xf32, #tpu.memory_space<vmem>>, %arg2: memref<288x32xf32, #tpu.memory_space<vmem>>, %arg3: memref<128x32xf32, #tpu.memory_space<vmem>>, %arg4: memref<1x1x32xf32, #tpu.memory_space<vmem>>, %arg5: memref<1x1x32xf32, #tpu.memory_space<vmem>>) attributes {dimension_semantics = [#tpu.dimension_semantics<parallel>], iteration_bounds = array<i64: 4>, scalar_prefetch = 0 : i64, scratch_operands = 0 : i64, tpu.core_type = #tpu.core_type<tc>, window_params = [{transform_indices = @transform_0, window_bounds = array<i64: 128, 288>}, {pipeline_mode = #tpu.pipeline_mode<synchronous>, transform_indices = @transform_1, window_bounds = array<i64: 288, 32>}, {transform_indices = @transform_2, window_bounds = array<i64: 128, 32>}, {transform_indices = @transform_3, window_bounds = array<i64: 1, 1, 32>}, {transform_indices = @transform_4, window_bounds = array<i64: 1, 1, 32>}]} {
    %c0 = arith.constant 0 : index
    %c0_0 = arith.constant 0 : index
    %0 = vector.load %arg1[%c0, %c0_0] : memref<128x288xf32, #tpu.memory_space<vmem>>, vector<128x288xf32>
    %c0_1 = arith.constant 0 : index
    %c0_2 = arith.constant 0 : index
    %1 = vector.load %arg2[%c0_1, %c0_2] : memref<288x32xf32, #tpu.memory_space<vmem>>, vector<288x32xf32>
    %cst = arith.constant dense<0.000000e+00> : vector<128x32xf32>
    %2 = tpu.matmul %0, %1, %cst {dimension_numbers = #tpu.dot_dimension_numbers<[1], [0], [0], [1], [0, 0, 1, 1], [], []>} : vector<128x288xf32>, vector<288x32xf32>, vector<128x32xf32> -> vector<128x32xf32>
    %c0_3 = arith.constant 0 : index
    %c0_4 = arith.constant 0 : index
    %3 = vector.load %arg3[%c0_3, %c0_4] : memref<128x32xf32, #tpu.memory_space<vmem>>, vector<128x32xf32>
    tpu.vector_store %arg3[%c0_3, %c0_4], %2 {strides = array<i32>} : memref<128x32xf32, #tpu.memory_space<vmem>>, vector<128x32xf32>,
    %cst_5 = arith.constant dense<0.000000e+00> : vector<32xf32>
    %4 = vector.multi_reduction <add>, %2, %cst_5 [0] : vector<128x32xf32> to vector<32xf32>
    %5 = vector.shape_cast %4 : vector<32xf32> to vector<1x32xf32>
    %c0_6 = arith.constant 0 : index
    %c0_7 = arith.constant 0 : index
    %c0_8 = arith.constant 0 : index
    %6 = vector.load %arg4[%c0_6, %c0_7, %c0_8] : memref<1x1x32xf32, #tpu.memory_space<vmem>>, vector<1x1x32xf32>
    %7 = vector.shape_cast %6 : vector<1x1x32xf32> to vector<1x32xf32>
    %8 = vector.shape_cast %5 : vector<1x32xf32> to vector<1x1x32xf32>
    tpu.vector_store %arg4[%c0_6, %c0_7, %c0_8], %8 {strides = array<i32>} : memref<1x1x32xf32, #tpu.memory_space<vmem>>, vector<1x1x32xf32>,
    %9 = arith.mulf %2, %2 : vector<128x32xf32>
    %cst_9 = arith.constant dense<0.000000e+00> : vector<32xf32>
    %10 = vector.multi_reduction <add>, %9, %cst_9 [0] : vector<128x32xf32> to vector<32xf32>
    %11 = vector.shape_cast %10 : vector<32xf32> to vector<1x32xf32>
    %c0_10 = arith.constant 0 : index
    %c0_11 = arith.constant 0 : index
    %c0_12 = arith.constant 0 : index
    %12 = vector.load %arg5[%c0_10, %c0_11, %c0_12] : memref<1x1x32xf32, #tpu.memory_space<vmem>>, vector<1x1x32xf32>
    %13 = vector.shape_cast %12 : vector<1x1x32xf32> to vector<1x32xf32>
    %14 = vector.shape_cast %11 : vector<1x32xf32> to vector<1x1x32xf32>
    tpu.vector_store %arg5[%c0_10, %c0_11, %c0_12], %14 {strides = array<i32>} : memref<1x1x32xf32, #tpu.memory_space<vmem>>, vector<1x1x32xf32>,
    return
  }
  func.func @transform_0(%arg0: i32) -> (i32, i32) {
    %c0_i32 = arith.constant 0 : i32
    %c0_i32_0 = arith.constant 0 : i32
    return %arg0, %c0_i32 : i32, i32
  }
  func.func @transform_1(%arg0: i32) -> (i32, i32) {
    %c0_i32 = arith.constant 0 : i32
    %c0_i32_0 = arith.constant 0 : i32
    %c0_i32_1 = arith.constant 0 : i32
    return %c0_i32, %c0_i32_0 : i32, i32
  }
  func.func @transform_2(%arg0: i32) -> (i32, i32) {
    %c0_i32 = arith.constant 0 : i32
    %c0_i32_0 = arith.constant 0 : i32
    return %arg0, %c0_i32 : i32, i32
  }
  func.func @transform_3(%arg0: i32) -> (i32, i32, i32) {
    %c0_i32 = arith.constant 0 : i32
    %c0_i32_0 = arith.constant 0 : i32
    %c0_i32_1 = arith.constant 0 : i32
    return %arg0, %c0_i32, %c0_i32_0 : i32, i32, i32
  }
  func.func @transform_4(%arg0: i32) -> (i32, i32, i32) {
    %c0_i32 = arith.constant 0 : i32
    %c0_i32_0 = arith.constant 0 : i32
    %c0_i32_1 = arith.constant 0 : i32
    return %arg0, %c0_i32, %c0_i32_0 : i32, i32, i32
  }
}

module attributes {stable_mosaic.version = 11 : i64} {
  func.func @_bn_relu_kernel(%arg0: i32, %arg1: memref<128x128xf32, #tpu.memory_space<vmem>>, %arg2: memref<1x128xf32, #tpu.memory_space<vmem>>, %arg3: memref<1x128xf32, #tpu.memory_space<vmem>>, %arg4: memref<128x128xf32, #tpu.memory_space<vmem>>) attributes {dimension_semantics = [#tpu.dimension_semantics<parallel>], iteration_bounds = array<i64: 1>, scalar_prefetch = 0 : i64, scratch_operands = 0 : i64, tpu.core_type = #tpu.core_type<tc>, window_params = [{transform_indices = @transform_0, window_bounds = array<i64: 128, 128>}, {pipeline_mode = #tpu.pipeline_mode<synchronous>, transform_indices = @transform_1, window_bounds = array<i64: 1, 128>}, {pipeline_mode = #tpu.pipeline_mode<synchronous>, transform_indices = @transform_2, window_bounds = array<i64: 1, 128>}, {transform_indices = @transform_3, window_bounds = array<i64: 128, 128>}]} {
    %c0 = arith.constant 0 : index
    %c0_0 = arith.constant 0 : index
    %0 = vector.load %arg1[%c0, %c0_0] : memref<128x128xf32, #tpu.memory_space<vmem>>, vector<128x128xf32>
    %c0_1 = arith.constant 0 : index
    %c0_2 = arith.constant 0 : index
    %1 = vector.load %arg2[%c0_1, %c0_2] : memref<1x128xf32, #tpu.memory_space<vmem>>, vector<1x128xf32>
    %2 = vector.broadcast %1 : vector<1x128xf32> to vector<128x128xf32>
    %3 = arith.mulf %0, %2 : vector<128x128xf32>
    %c0_3 = arith.constant 0 : index
    %c0_4 = arith.constant 0 : index
    %4 = vector.load %arg3[%c0_3, %c0_4] : memref<1x128xf32, #tpu.memory_space<vmem>>, vector<1x128xf32>
    %5 = vector.broadcast %4 : vector<1x128xf32> to vector<128x128xf32>
    %6 = arith.addf %3, %5 : vector<128x128xf32>
    %cst = arith.constant 0.000000e+00 : f32
    %7 = vector.broadcast %cst : f32 to vector<128x128xf32>
    %8 = arith.maximumf %6, %7 : vector<128x128xf32>
    %c0_5 = arith.constant 0 : index
    %c0_6 = arith.constant 0 : index
    %9 = vector.load %arg4[%c0_5, %c0_6] : memref<128x128xf32, #tpu.memory_space<vmem>>, vector<128x128xf32>
    tpu.vector_store %arg4[%c0_5, %c0_6], %8 {strides = array<i32>} : memref<128x128xf32, #tpu.memory_space<vmem>>, vector<128x128xf32>,
    return
  }
  func.func @transform_0(%arg0: i32) -> (i32, i32) {
    %c0_i32 = arith.constant 0 : i32
    %c0_i32_0 = arith.constant 0 : i32
    return %arg0, %c0_i32 : i32, i32
  }
  func.func @transform_1(%arg0: i32) -> (i32, i32) {
    %c0_i32 = arith.constant 0 : i32
    %c0_i32_0 = arith.constant 0 : i32
    %c0_i32_1 = arith.constant 0 : i32
    return %c0_i32, %c0_i32_0 : i32, i32
  }
  func.func @transform_2(%arg0: i32) -> (i32, i32) {
    %c0_i32 = arith.constant 0 : i32
    %c0_i32_0 = arith.constant 0 : i32
    %c0_i32_1 = arith.constant 0 : i32
    return %c0_i32, %c0_i32_0 : i32, i32
  }
  func.func @transform_3(%arg0: i32) -> (i32, i32) {
    %c0_i32 = arith.constant 0 : i32
    %c0_i32_0 = arith.constant 0 : i32
    return %arg0, %c0_i32 : i32, i32
  }
}

module attributes {stable_mosaic.version = 11 : i64} {
  func.func @_bn_res_relu_kernel(%arg0: i32, %arg1: memref<128x128xf32, #tpu.memory_space<vmem>>, %arg2: memref<1x128xf32, #tpu.memory_space<vmem>>, %arg3: memref<1x128xf32, #tpu.memory_space<vmem>>, %arg4: memref<128x128xf32, #tpu.memory_space<vmem>>, %arg5: memref<128x128xf32, #tpu.memory_space<vmem>>) attributes {dimension_semantics = [#tpu.dimension_semantics<parallel>], iteration_bounds = array<i64: 1>, scalar_prefetch = 0 : i64, scratch_operands = 0 : i64, tpu.core_type = #tpu.core_type<tc>, window_params = [{transform_indices = @transform_0, window_bounds = array<i64: 128, 128>}, {pipeline_mode = #tpu.pipeline_mode<synchronous>, transform_indices = @transform_1, window_bounds = array<i64: 1, 128>}, {pipeline_mode = #tpu.pipeline_mode<synchronous>, transform_indices = @transform_2, window_bounds = array<i64: 1, 128>}, {transform_indices = @transform_3, window_bounds = array<i64: 128, 128>}, {transform_indices = @transform_4, window_bounds = array<i64: 128, 128>}]} {
    %c0 = arith.constant 0 : index
    %c0_0 = arith.constant 0 : index
    %0 = vector.load %arg1[%c0, %c0_0] : memref<128x128xf32, #tpu.memory_space<vmem>>, vector<128x128xf32>
    %c0_1 = arith.constant 0 : index
    %c0_2 = arith.constant 0 : index
    %1 = vector.load %arg2[%c0_1, %c0_2] : memref<1x128xf32, #tpu.memory_space<vmem>>, vector<1x128xf32>
    %2 = vector.broadcast %1 : vector<1x128xf32> to vector<128x128xf32>
    %3 = arith.mulf %0, %2 : vector<128x128xf32>
    %c0_3 = arith.constant 0 : index
    %c0_4 = arith.constant 0 : index
    %4 = vector.load %arg3[%c0_3, %c0_4] : memref<1x128xf32, #tpu.memory_space<vmem>>, vector<1x128xf32>
    %5 = vector.broadcast %4 : vector<1x128xf32> to vector<128x128xf32>
    %6 = arith.addf %3, %5 : vector<128x128xf32>
    %c0_5 = arith.constant 0 : index
    %c0_6 = arith.constant 0 : index
    %7 = vector.load %arg4[%c0_5, %c0_6] : memref<128x128xf32, #tpu.memory_space<vmem>>, vector<128x128xf32>
    %8 = arith.addf %6, %7 : vector<128x128xf32>
    %cst = arith.constant 0.000000e+00 : f32
    %9 = vector.broadcast %cst : f32 to vector<128x128xf32>
    %10 = arith.maximumf %8, %9 : vector<128x128xf32>
    %c0_7 = arith.constant 0 : index
    %c0_8 = arith.constant 0 : index
    %11 = vector.load %arg5[%c0_7, %c0_8] : memref<128x128xf32, #tpu.memory_space<vmem>>, vector<128x128xf32>
    tpu.vector_store %arg5[%c0_7, %c0_8], %10 {strides = array<i32>} : memref<128x128xf32, #tpu.memory_space<vmem>>, vector<128x128xf32>,
    return
  }
  func.func @transform_0(%arg0: i32) -> (i32, i32) {
    %c0_i32 = arith.constant 0 : i32
    %c0_i32_0 = arith.constant 0 : i32
    return %arg0, %c0_i32 : i32, i32
  }
  func.func @transform_1(%arg0: i32) -> (i32, i32) {
    %c0_i32 = arith.constant 0 : i32
    %c0_i32_0 = arith.constant 0 : i32
    %c0_i32_1 = arith.constant 0 : i32
    return %c0_i32, %c0_i32_0 : i32, i32
  }
  func.func @transform_2(%arg0: i32) -> (i32, i32) {
    %c0_i32 = arith.constant 0 : i32
    %c0_i32_0 = arith.constant 0 : i32
    %c0_i32_1 = arith.constant 0 : i32
    return %c0_i32, %c0_i32_0 : i32, i32
  }
  func.func @transform_3(%arg0: i32) -> (i32, i32) {
    %c0_i32 = arith.constant 0 : i32
    %c0_i32_0 = arith.constant 0 : i32
    return %arg0, %c0_i32 : i32, i32
  }
  func.func @transform_4(%arg0: i32) -> (i32, i32) {
    %c0_i32 = arith.constant 0 : i32
    %c0_i32_0 = arith.constant 0 : i32
    return %arg0, %c0_i32 : i32, i32
  }
}

</mosaic_0001>

<bundles_post_ra>
// kernel: basic_block_forward.4
= control target key start
LH: loop header
LB: loop body
LE: loop exit
PB: predicated region body
PF: predicated region fallthrough
CT: control target
= control target key end

     0   :  { %s1116_s15 = smov 0   ;;  %s1400_s0 = inlined_call_operand.vmem [shape: f32[512,288], index: 0, kind: input, shape index: {}]   ;;  %s1401_s1 = inlined_call_operand.vmem [shape: f32[288,32], index: 1, kind: input, shape index: {}]   ;;  %s1402_s2 = inlined_call_operand.vmem [shape: f32[512,32], index: 2, kind: output, shape index: {0}]   ;;  %s1403_s3 = inlined_call_operand.vmem [shape: f32[4,1,32], index: 3, kind: output, shape index: {1}]   ;;  %s1404_s4 = inlined_call_operand.vmem [shape: f32[4,1,32], index: 4, kind: output, shape index: {2}]  }
   0x1 LB: > { %s1122_s16 = sadd.s32 4294967295, %s1089_s15   ;;  %p863_p0 = scmp.ge.s32.totalorder %s1089_s15, 1  ;;  %s1089_s15 = sphi %s1116_s15, %s15_s15  }
   0x2   : > { %p169_p1 = scmp.lt.s32.totalorder %s1089_s15, 5 }
   0x4   : > { %p170_p2 = pnand %p863_p0, %p169_p1 }
   0x5   : > { %v285_v0 = vld [vmem:[%s1401_s1 + $0x80] sm:$0xff] (!%p170_p2)  ;;  %v286_v1 = vld [vmem:[%s1401_s1 + $0x88] sm:$0xff] (!%p170_p2)  ;;  %s864_s23 = sshll.u32 (!%p170_p2), %s1122_s16, 4  ;;  %v287_v5 = vld [vmem:[%s1401_s1 + $0x90] sm:$0xff] (!%p170_p2)  ;;  %vm305_vm0 = vcmask (!%p170_p2), 261120   ;;  %p215_p4 = scmp.lt.s32.totalorder (!%p170_p2), %s1122_s16, 3 }
   0x6   : > { %173 = sbr.rel (%p170_p2) target bundleno = 327 (0x147), region = 28  ;;  %v269_v2 = vld [vmem:[%s1401_s1] sm:$0xff] (!%p170_p2)  ;;  %v1018_v3 = vpack.c.bf16 (!%p170_p2), %v286_v1, %v285_v0  ;;  %v270_v4 = vld [vmem:[%s1401_s1 + $0x8] sm:$0xff] (!%p170_p2)  ;;  %v288_v6 = vld [vmem:[%s1401_s1 + $0x98] sm:$0xff] (!%p170_p2)  ;;  %p203_p3 = scmp.lt.s32.totalorder (!%p170_p2), %s864_s23, 63  ;;  %vm697_vm1 = vcmask (!%p170_p2), 253952  }
   0x7   : > { %v1020_v7 = vpack.c.bf16 (!%p170_p2), %v270_v4, %v269_v2  ;;  %v1022_v8 = vpack.c.bf16 (!%p170_p2), %v288_v6, %v287_v5  ;;  %v271_v9 = vld [vmem:[%s1401_s1 + $0x10] sm:$0xff] (!%p170_p2)  ;;  %v272_v10 = vld [vmem:[%s1401_s1 + $0x18] sm:$0xff] (!%p170_p2)  ;;  %v289_v11 = vld [vmem:[%s1401_s1 + $0xa0] sm:$0xff] (!%p170_p2) }
   0x8   : > { %1019 = vmatprep.subr.bf16.mxu0 (!%p170_p2), %v1018_v3  ;;  %1058 = vmatprep.subr.bf16.mxu1 (!%p170_p2), %v1018_v3  ;;  %v290_v12 = vld [vmem:[%s1401_s1 + $0xa8] sm:$0xff] (!%p170_p2)  ;;  %v1024_v13 = vpack.c.bf16 (!%p170_p2), %v272_v10, %v271_v9  ;;  %v273_v15 = vld [vmem:[%s1401_s1 + $0x20] sm:$0xff] (!%p170_p2)  ;;  %v291_v17 = vld [vmem:[%s1401_s1 + $0xb0] sm:$0xff] (!%p170_p2) }
   0x9   : > { %1021 = vmatpush3.bf16.msra.mxu0 (!%p170_p2), %v1020_v7  ;;  %1066 = vmatpush3.bf16.msra.mxu1 (!%p170_p2), %v1020_v7  ;;  %v1026_v14 = vpack.c.bf16 (!%p170_p2), %v290_v12, %v289_v11  ;;  %v274_v16 = vld [vmem:[%s1401_s1 + $0x28] sm:$0xff] (!%p170_p2)  ;;  %v292_v18 = vld [vmem:[%s1401_s1 + $0xb8] sm:$0xff] (!%p170_p2)  ;;  %v275_v21 = vld [vmem:[%s1401_s1 + $0x30] sm:$0xff] (!%p170_p2) }
   0xa   : > { %1023 = vmatprep.subr.bf16.mxu0 (!%p170_p2), %v1022_v8  ;;  %1059 = vmatprep.subr.bf16.mxu1 (!%p170_p2), %v1022_v8  ;;  %v1028_v19 = vpack.c.bf16 (!%p170_p2), %v274_v16, %v273_v15  ;;  %v1030_v20 = vpack.c.bf16 (!%p170_p2), %v292_v18, %v291_v17  ;;  %v276_v22 = vld [vmem:[%s1401_s1 + $0x38] sm:$0xff] (!%p170_p2)  ;;  %v293_v23 = vld [vmem:[%s1401_s1 + $0xc0] sm:$0xff] (!%p170_p2)  ;;  %v294_v24 = vld [vmem:[%s1401_s1 + $0xc8] sm:$0xff] (!%p170_p2) }
   0xb   : > { %v1032_v27 = vpack.c.bf16 (!%p170_p2), %v276_v22, %v275_v21  ;;  %v1034_v28 = vpack.c.bf16 (!%p170_p2), %v294_v24, %v293_v23  ;;  %v277_v29 = vld [vmem:[%s1401_s1 + $0x40] sm:$0xff] (!%p170_p2)  ;;  %v278_v30 = vld [vmem:[%s1401_s1 + $0x48] sm:$0xff] (!%p170_p2)  ;;  %v295_v31 = vld [vmem:[%s1401_s1 + $0xd0] sm:$0xff] (!%p170_p2) }
   0xc   : > { %v296_v32 = vld [vmem:[%s1401_s1 + $0xd8] sm:$0xff] (!%p170_p2)  ;;  %v1036_v33 = vpack.c.bf16 (!%p170_p2), %v278_v30, %v277_v29  ;;  %v279_v35 = vld [vmem:[%s1401_s1 + $0x50] sm:$0xff] (!%p170_p2)  ;;  %v297_v37 = vld [vmem:[%s1401_s1 + $0xe0] sm:$0xff] (!%p170_p2) }
   0xd   : > { %s1406_s23 = smov (!%p203_p3, %s864_s23), 63  ;;  %1025 = vmatpush3.bf16.msra.mxu0 %v1024_v13  ;;  %1067 = vmatpush3.bf16.msra.mxu1 %v1024_v13  ;;  %v1038_v34 = vpack.c.bf16 %v296_v32, %v295_v31  ;;  %v280_v36 = vld [vmem:[%s1401_s1 + $0x58] sm:$0xff]  ;;  %v298_v38 = vld [vmem:[%s1401_s1 + $0xe8] sm:$0xff]  ;;  %v281_v41 = vld [vmem:[%s1401_s1 + $0x60] sm:$0xff]  ;;  %s1408_s16 = smov (!%p215_p4, %s1122_s16), 3 }
   0xe   : > { %s1074_s18 = smul.u32 24, %s1406_s23  ;;  %1027 = vmatprep.subr.bf16.mxu0 %v1026_v14  ;;  %1060 = vmatprep.subr.bf16.mxu1 %v1026_v14  ;;  %v1040_v39 = vpack.c.bf16 %v280_v36, %v279_v35  ;;  %v1042_v40 = vpack.c.bf16 %v298_v38, %v297_v37  ;;  %v282_v42 = vld [vmem:[%s1401_s1 + $0x68] sm:$0xff]  ;;  %v299_v43 = vld [vmem:[%s1401_s1 + $0xf0] sm:$0xff]  ;;  %v300_v44 = vld [vmem:[%s1401_s1 + $0xf8] sm:$0xff]  ;;  %s217_s5 = scalar_lea.vmem %s1403_s3, %s1408_s16 }
   0xf   : > { %v1044_v45 = vpack.c.bf16 %v282_v42, %v281_v41  ;;  %v1046_v46 = vpack.c.bf16 %v300_v44, %v299_v43  ;;  %v283_v47 = vld [vmem:[%s1401_s1 + $0x70] sm:$0xff]  ;;  %v284_v48 = vld [vmem:[%s1401_s1 + $0x78] sm:$0xff]  ;;  %v301_v49 = vld [vmem:[%s1401_s1 + $0x100] sm:$0xff]  ;;  %s220_s8 = scalar_lea.vmem %s1404_s4, %s1408_s16 }
  0x10   : > { %s1175_s26 = scalar_lea.vmem %s1400_s0, %s1074_s18  ;;  %v302_v50 = vld [vmem:[%s1401_s1 + $0x108] sm:$0xff]  ;;  %v1048_v51 = vpack.c.bf16 %v284_v48, %v283_v47  ;;  %v303_v53 = vld [vmem:[%s1401_s1 + $0x110] sm:$0xff]  ;;  %v304_v54 = vld [vmem:[%s1401_s1 + $0x118] sm:$0xff] }
  0x11   : > { %v222_v25 = vld [vmem:[%s1175_s26 + $0x8] sm:$0xff]  ;;  %1029 = vmatpush3.bf16.msra.mxu0 %v1028_v19  ;;  %1068 = vmatpush3.bf16.msra.mxu1 %v1028_v19  ;;  %v1050_v52 = vpack.c.bf16 %v302_v50, %v301_v49  ;;  %v221_v55 = vld [vmem:[%s1175_s26] sm:$0xff]  ;;  %v1054_v59 = vpack.c.bf16 %v304_v54, %v303_v53  ;;  %v224_v60 = vld [vmem:[%s1175_s26 + $0x18] sm:$0xff] }
  0x12   : > { %418 = vmatprep.mubr.f32.mxu0 %v222_v25  ;;  %v258_v26 = vld [vmem:[%s1175_s26 + $0x128] sm:$0xff]  ;;  %1031 = vmatprep.subr.bf16.mxu0 %v1030_v20  ;;  %v257_v56 = vld [vmem:[%s1175_s26 + $0x120] sm:$0xff]  ;;  %v260_v61 = vld [vmem:[%s1175_s26 + $0x138] sm:$0xff] }
  0x13   : > { %1061 = vmatprep.subr.bf16.mxu1 %v1030_v20  ;;  %478 = vmatprep.mubr.f32.mxu1 %v258_v26  ;;  %v225_v57 = vld [vmem:[%s1175_s26 + $0x20] sm:$0xff]  ;;  %v228_v62 = vld [vmem:[%s1175_s26 + $0x38] sm:$0xff]  ;;  %v227_v0 = vld [vmem:[%s1175_s26 + $0x30] sm:$0xff] }
  0x14   : > { %v261_v58 = vld [vmem:[%s1175_s26 + $0x140] sm:$0xff]  ;;  %v264_v63 = vld [vmem:[%s1175_s26 + $0x158] sm:$0xff]  ;;  %v263_v1 = vld [vmem:[%s1175_s26 + $0x150] sm:$0xff] }
  0x15   : > { %1033 = vmatpush3.bf16.msra.mxu0 %v1032_v27  ;;  %1069 = vmatpush3.bf16.msra.mxu1 %v1032_v27  ;;  %v231_v2 = vld [vmem:[%s1175_s26 + $0x50] sm:$0xff]  ;;  %v230_v4 = vld [vmem:[%s1175_s26 + $0x48] sm:$0xff]  ;;  %v233_v8 = vld [vmem:[%s1175_s26 + $0x60] sm:$0xff] }
  0x16   : > { %1035 = vmatprep.subr.bf16.mxu0 %v1034_v28  ;;  %1062 = vmatprep.subr.bf16.mxu1 %v1034_v28  ;;  %v267_v3 = vld [vmem:[%s1175_s26 + $0x170] sm:$0xff]  ;;  %v266_v5 = vld [vmem:[%s1175_s26 + $0x168] sm:$0xff]  ;;  %v237_v10 = vld [vmem:[%s1175_s26 + $0x80] sm:$0xff] }
  0x17   : > { %v234_v6 = vld [vmem:[%s1175_s26 + $0x68] sm:$0xff]  ;;  %v223_v7 = vld [vmem:[%s1175_s26 + $0x10] sm:$0xff]  ;;  %v229_v11 = vld [vmem:[%s1175_s26 + $0x40] sm:$0xff] }
  0x18   : > { %v226_v9 = vld [vmem:[%s1175_s26 + $0x28] sm:$0xff]  ;;  %v236_v12 = vld [vmem:[%s1175_s26 + $0x78] sm:$0xff]  ;;  %v235_v15 = vld [vmem:[%s1175_s26 + $0x70] sm:$0xff] }
  0x19   : > { %1037 = vmatpush3.bf16.msra.mxu0 %v1036_v33  ;;  %1070 = vmatpush3.bf16.msra.mxu1 %v1036_v33  ;;  %v232_v13 = vld [vmem:[%s1175_s26 + $0x58] sm:$0xff]  ;;  %v239_v16 = vld [vmem:[%s1175_s26 + $0x90] sm:$0xff]  ;;  %v238_v17 = vld [vmem:[%s1175_s26 + $0x88] sm:$0xff] }
  0x1a   : > { %1039 = vmatprep.subr.bf16.mxu0 %v1038_v34  ;;  %1063 = vmatprep.subr.bf16.mxu1 %v1038_v34  ;;  %v240_v14 = vld [vmem:[%s1175_s26 + $0x98] sm:$0xff]  ;;  %v243_v18 = vld [vmem:[%s1175_s26 + $0xb0] sm:$0xff]  ;;  %v241_v19 = vld [vmem:[%s1175_s26 + $0xa0] sm:$0xff] }
  0x1b   : > { %v242_v20 = vld [vmem:[%s1175_s26 + $0xa8] sm:$0xff]  ;;  %v244_v21 = vld [vmem:[%s1175_s26 + $0xb8] sm:$0xff]  ;;  %v247_v23 = vld [vmem:[%s1175_s26 + $0xd0] sm:$0xff] }
  0x1c   : > { %v246_v22 = vld [vmem:[%s1175_s26 + $0xc8] sm:$0xff]  ;;  %v245_v24 = vld [vmem:[%s1175_s26 + $0xc0] sm:$0xff]  ;;  %v248_v28 = vld [vmem:[%s1175_s26 + $0xd8] sm:$0xff] }
  0x1d   : > { %1041 = vmatpush3.bf16.msra.mxu0 %v1040_v39  ;;  %1071 = vmatpush3.bf16.msra.mxu1 %v1040_v39  ;;  %v250_v25 = vld [vmem:[%s1175_s26 + $0xe8] sm:$0xff]  ;;  %v249_v26 = vld [vmem:[%s1175_s26 + $0xe0] sm:$0xff]  ;;  %v256_v29 = vld [vmem:[%s1175_s26 + $0x118] sm:$0xff] }
  0x1e   : > { %1043 = vmatprep.subr.bf16.mxu0 %v1042_v40  ;;  %1064 = vmatprep.subr.bf16.mxu1 %v1042_v40  ;;  %v253_v27 = vld [vmem:[%s1175_s26 + $0x100] sm:$0xff]  ;;  %v252_v30 = vld [vmem:[%s1175_s26 + $0xf8] sm:$0xff]  ;;  %v259_v31 = vld [vmem:[%s1175_s26 + $0x130] sm:$0xff] }
  0x1f   : > { %v251_v32 = vld [vmem:[%s1175_s26 + $0xf0] sm:$0xff]  ;;  %v262_v33 = vld [vmem:[%s1175_s26 + $0x148] sm:$0xff]  ;;  %v265_v35 = vld [vmem:[%s1175_s26 + $0x160] sm:$0xff] }
  0x20   : > { %v255_v34 = vld [vmem:[%s1175_s26 + $0x110] sm:$0xff]  ;;  %v254_v36 = vld [vmem:[%s1175_s26 + $0x108] sm:$0xff]  ;;  %v268_v37 = vld [vmem:[%s1175_s26 + $0x178] sm:$0xff]  ;;  %s867_s26 = sshll.u32 %s1406_s23, 3 }
  0x21   : > { %1045 = vmatpush3.bf16.msra.mxu0 %v1044_v45  ;;  %1072 = vmatpush3.bf16.msra.mxu1 %v1044_v45  ;;  %s1319_s29 = scalar_lea.vmem %s1402_s2, %s867_s26 }
  0x22   : > { %1047 = vmatprep.subr.bf16.mxu0 %v1046_v46  ;;  %1065 = vmatprep.subr.bf16.mxu1 %v1046_v46 }
  0x25   : > { %1049 = vmatpush3.bf16.msra.mxu0 %v1048_v51  ;;  %1073 = vmatpush3.bf16.msra.mxu1 %v1048_v51 }
  0x26   : > { %1051 = vmatprep.subr.bf16.mxu1 %v1050_v52 }
  0x28   : > { %419 = vmatmul.mubr.f32.vlgmr.msra.gmra.mrb[0].mxu0 %v221_v55  ;;  %479 = vmatmul.mubr.f32.vlgmr.msra.gmra.mrb[0].mxu1 %v257_v56 }
  0x29   : > { %423 = vmatprep.mubr.f32.mxu0 %v225_v57  ;;  %483 = vmatprep.mubr.f32.mxu1 %v261_v58 }
  0x2a   : > { %1053 = vmatpush3.bf16.msra.mxu1 %v1050_v52 }
  0x2b   : > { %1055 = vmatprep.subr.bf16.mxu1 %v1054_v59 }
  0x2c   : > { %424 = vmatmul.mubr.f32.gmra.mrb[2].mxu0 %v224_v60  ;;  %484 = vmatmul.mubr.f32.gmra.mrb[2].mxu1 %v260_v61 }
  0x2d   : > { %428 = vmatprep.mubr.f32.mxu0 %v228_v62  ;;  %488 = vmatprep.mubr.f32.mxu1 %v264_v63 }
  0x2e   : > { %1057 = vmatpush3.bf16.msra.mxu1 %v1054_v59 }
  0x30   : > { %429 = vmatmul.mubr.f32.gmra.mrb[4].mxu0 %v227_v0  ;;  %489 = vmatmul.mubr.f32.gmra.mrb[4].mxu1 %v263_v1 }
  0x31   : > { %433 = vmatprep.mubr.f32.mxu0 %v231_v2  ;;  %493 = vmatprep.mubr.f32.mxu1 %v267_v3 }
  0x34   : > { %434 = vmatmul.mubr.f32.gmra.mrb[6].mxu0 %v230_v4  ;;  %494 = vmatmul.mubr.f32.gmra.mrb[6].mxu1 %v266_v5 }
  0x35   : > { %438 = vmatprep.mubr.f32.mxu0 %v234_v6  ;;  %994 = vmatprep.mubr.msk.f32.mxu1 %vm305_vm0, %v223_v7 }
  0x38   : > { %439 = vmatmul.mubr.f32.gmra.mrb[8].mxu0 %v233_v8  ;;  %995 = vmatmul.mubr.msk.f32.vlgmr.msra.gmra.mrb[8].mxu1 %vm305_vm0, %v226_v9 }
  0x39   : > { %443 = vmatprep.mubr.f32.mxu0 %v237_v10  ;;  %997 = vmatprep.mubr.msk.f32.mxu1 %vm305_vm0, %v229_v11 }
  0x3c   : > { %444 = vmatmul.mubr.f32.gmra.mrb[10].mxu0 %v236_v12  ;;  %998 = vmatmul.mubr.msk.f32.gmra.mrb[10].mxu1 %vm305_vm0, %v232_v13 }
  0x3d   : > { %448 = vmatprep.mubr.f32.mxu0 %v240_v14  ;;  %1000 = vmatprep.mubr.msk.f32.mxu1 %vm305_vm0, %v235_v15 }
  0x40   : > { %449 = vmatmul.mubr.f32.gmra.mrb[12].mxu0 %v239_v16  ;;  %1001 = vmatmul.mubr.msk.f32.gmra.mrb[12].mxu1 %vm305_vm0, %v238_v17 }
  0x41   : > { %453 = vmatprep.mubr.f32.mxu0 %v243_v18  ;;  %1003 = vmatprep.mubr.msk.f32.mxu1 %vm305_vm0, %v241_v19 }
  0x44   : > { %454 = vmatmul.mubr.f32.gmra.mrb[14].mxu0 %v242_v20  ;;  %1004 = vmatmul.mubr.msk.f32.gmra.mrb[14].mxu1 %vm305_vm0, %v244_v21 }
  0x45   : > { %458 = vmatprep.mubr.f32.mxu0 %v246_v22  ;;  %1006 = vmatprep.mubr.msk.f32.mxu1 %vm305_vm0, %v247_v23 }
  0x48   : > { %459 = vmatmul.mubr.f32.gmra.mrb[16].mxu0 %v245_v24  ;;  %1007 = vmatmul.mubr.msk.f32.gmra.mrb[16].mxu1 %vm305_vm0, %v250_v25 }
  0x49   : > { %463 = vmatprep.mubr.f32.mxu0 %v249_v26  ;;  %1009 = vmatprep.mubr.msk.f32.mxu1 %vm305_vm0, %v253_v27 }
  0x4c   : > { %464 = vmatmul.mubr.f32.gmra.mrb[18].mxu0 %v248_v28  ;;  %1010 = vmatmul.mubr.msk.f32.gmra.mrb[18].mxu1 %vm305_vm0, %v256_v29 }
  0x4d   : > { %468 = vmatprep.mubr.f32.mxu0 %v252_v30  ;;  %1012 = vmatprep.mubr.msk.f32.mxu1 %vm305_vm0, %v259_v31 }
  0x50   : > { %469 = vmatmul.mubr.f32.gmra.mrb[20].mxu0 %v251_v32  ;;  %1013 = vmatmul.mubr.msk.f32.gmra.mrb[20].mxu1 %vm305_vm0, %v262_v33 }
  0x51   : > { %473 = vmatprep.mubr.f32.mxu0 %v255_v34  ;;  %1015 = vmatprep.mubr.msk.f32.mxu1 %vm305_vm0, %v265_v35 }
  0x54   : > { %474 = vmatmul.mubr.f32.gmra.mrb[22].mxu0 %v254_v36  ;;  %1016 = vmatmul.mubr.msk.f32.gmra.mrb[22].mxu1 %vm305_vm0, %v268_v37 }
  0xfb   : > { %v918_v38 = vpop.f32.mrb[0].mxu0  ;;  %v954_v39 = vpop.f32.mrb[0].mxu1 }
  0xfc   : > { %v919_v40 = vpop.f32.mrb[1].mxu0  ;;  %v955_v41 = vpop.f32.mrb[1].mxu1 }
  0xfd   : > { %v920_v42 = vadd.f32 %v919_v40, %v918_v38  ;;  %v1307_v43 = vadd.f32 %v955_v41, %v954_v39 }
  0xff   : > { %v921_v44 = vpop.f32.mrb[2].mxu0  ;;  %v957_v45 = vpop.f32.mrb[2].mxu1 }
 0x100   : > { %v922_v46 = vpop.f32.mrb[3].mxu0  ;;  %v958_v47 = vpop.f32.mrb[3].mxu1 }
 0x101   : > { %v923_v48 = vadd.f32 %v922_v46, %v921_v44  ;;  %v1309_v49 = vadd.f32 %v958_v47, %v957_v45 }
 0x103   : > { %v924_v50 = vpop.f32.mrb[4].mxu0  ;;  %v960_v51 = vpop.f32.mrb[4].mxu1 }
 0x104   : > { %v925_v52 = vpop.f32.mrb[5].mxu0  ;;  %v961_v53 = vpop.f32.mrb[5].mxu1 }
 0x105   : > { %v926_v54 = vadd.f32 %v925_v52, %v924_v50  ;;  %v1311_v55 = vadd.f32 %v961_v53, %v960_v51 }
 0x107   : > { %v927_v56 = vpop.f32.mrb[6].mxu0  ;;  %v963_v57 = vpop.f32.mrb[6].mxu1 }
 0x108   : > { %v928_v58 = vpop.f32.mrb[7].mxu0  ;;  %v964_v59 = vpop.f32.mrb[7].mxu1 }
 0x109   : > { %v929_v60 = vadd.f32 %v928_v58, %v927_v56  ;;  %v1314_v61 = vadd.f32 %v964_v59, %v963_v57 }
 0x10b   : > { %v930_v62 = vpop.f32.mrb[8].mxu0  ;;  %v996_v63 = vpop.f32.mrb[8].mxu1 }
 0x10c   : > { %v571_v0 = vadd.f32 %v996_v63, %v923_v48  ;;  %v931_v1 = vpop.f32.mrb[9].mxu0  ;;  %v565_v2 = vpop.f32.mrb[9].mxu1 }
 0x10d   : > { %v932_v3 = vadd.f32 %v931_v1, %v930_v62  ;;  %v566_v4 = vadd.f32 %v920_v42, %v565_v2 }
 0x10e   : > { %645 = vst.msk [vmem:[%s1319_s29 + $0x8] sm:$0xff] %vm305_vm0, %v571_v0  ;;  %v661_v5 = vsel %vm305_vm0, %v571_v0, 0.0  ;;  %v700_v6 = vmul.f32 %v571_v0, %v571_v0 }
 0x10f   : > { %644 = vst.msk [vmem:[%s1319_s29] sm:$0xff] %vm305_vm0, %v566_v4  ;;  %v660_v7 = vsel %vm305_vm0, %v566_v4, 0.0  ;;  %v699_v8 = vmul.f32 %v566_v4, %v566_v4  ;;  %v933_v9 = vpop.f32.mrb[10].mxu0  ;;  %v999_v10 = vpop.f32.mrb[10].mxu1 }
 0x110   : > { %v716_v11 = vsel %vm305_vm0, %v700_v6, 0.0  ;;  %v662_v12 = vadd.f32 %v661_v5, %v660_v7  ;;  %v581_v13 = vadd.f32 %v999_v10, %v929_v60  ;;  %v934_v14 = vpop.f32.mrb[11].mxu0  ;;  %v575_v15 = vpop.f32.mrb[11].mxu1 }
 0x111   : > { %v715_v16 = vsel %vm305_vm0, %v699_v8, 0.0  ;;  %v935_v17 = vadd.f32 %v934_v14, %v933_v9  ;;  %v576_v18 = vadd.f32 %v926_v54, %v575_v15 }
 0x112   : > { %v717_v19 = vadd.f32 %v716_v11, %v715_v16  ;;  %647 = vst.msk [vmem:[%s1319_s29 + $0x18] sm:$0xff] %vm305_vm0, %v581_v13  ;;  %v702_v20 = vmul.f32 %v581_v13, %v581_v13  ;;  %v665_v29 = vsel %vm305_vm0, %v581_v13, 0.0 }
 0x113   : > { %646 = vst.msk [vmem:[%s1319_s29 + $0x10] sm:$0xff] %vm305_vm0, %v576_v18  ;;  %v663_v21 = vsel %vm305_vm0, %v576_v18, 0.0  ;;  %v701_v22 = vmul.f32 %v576_v18, %v576_v18  ;;  %v936_v23 = vpop.f32.mrb[12].mxu0  ;;  %v1002_v24 = vpop.f32.mrb[12].mxu1 }
 0x114   : > { %v664_v25 = vadd.f32 %v663_v21, %v662_v12  ;;  %v591_v26 = vadd.f32 %v1002_v24, %v935_v17  ;;  %v937_v27 = vpop.f32.mrb[13].mxu0  ;;  %v585_v28 = vpop.f32.mrb[13].mxu1  ;;  %v720_v35 = vsel %vm305_vm0, %v702_v20, 0.0 }
 0x115   : > { %v718_v30 = vsel %vm305_vm0, %v701_v22, 0.0  ;;  %v938_v31 = vadd.f32 %v937_v27, %v936_v23  ;;  %v586_v32 = vadd.f32 %v932_v3, %v585_v28 }
 0x116   : > { %v719_v33 = vadd.f32 %v718_v30, %v717_v19  ;;  %649 = vst.msk [vmem:[%s1319_s29 + $0x28] sm:$0xff] %vm305_vm0, %v591_v26  ;;  %v666_v34 = vadd.f32 %v665_v29, %v664_v25  ;;  %v704_v36 = vmul.f32 %v591_v26, %v591_v26  ;;  %v669_v46 = vsel %vm305_vm0, %v591_v26, 0.0 }
 0x117   : > { %648 = vst.msk [vmem:[%s1319_s29 + $0x20] sm:$0xff] %vm305_vm0, %v586_v32  ;;  %v667_v37 = vsel %vm305_vm0, %v586_v32, 0.0  ;;  %v703_v38 = vmul.f32 %v586_v32, %v586_v32  ;;  %v939_v39 = vpop.f32.mrb[14].mxu0  ;;  %v1005_v40 = vpop.f32.mrb[14].mxu1 }
 0x118   : > { %v668_v41 = vadd.f32 %v667_v37, %v666_v34  ;;  %v721_v42 = vadd.f32 %v720_v35, %v719_v33  ;;  %v940_v44 = vpop.f32.mrb[15].mxu0  ;;  %v595_v45 = vpop.f32.mrb[15].mxu1  ;;  %v724_v53 = vsel %vm305_vm0, %v704_v36, 0.0 }
 0x119   : > { %v722_v47 = vsel %vm305_vm0, %v703_v38, 0.0  ;;  %v941_v48 = vadd.f32 %v940_v44, %v939_v39  ;;  %v596_v50 = vadd.f32 %v938_v31, %v595_v45 }
 0x11a   : > { %v723_v51 = vadd.f32 %v722_v47, %v721_v42  ;;  %v670_v52 = vadd.f32 %v669_v46, %v668_v41 }
 0x11b   : > { %v601_v54 = vadd.f32 %v1005_v40, %v941_v48  ;;  %650 = vst.msk [vmem:[%s1319_s29 + $0x30] sm:$0xff] %vm305_vm0, %v596_v50  ;;  %v671_v56 = vsel %vm305_vm0, %v596_v50, 0.0  ;;  %v705_v57 = vmul.f32 %v596_v50, %v596_v50  ;;  %v942_v58 = vpop.f32.mrb[16].mxu0  ;;  %v1008_v59 = vpop.f32.mrb[16].mxu1 }
 0x11c   : > { %v672_v60 = vadd.f32 %v671_v56, %v670_v52  ;;  %v725_v62 = vadd.f32 %v724_v53, %v723_v51  ;;  %v943_v63 = vpop.f32.mrb[17].mxu0  ;;  %v605_v0 = vpop.f32.mrb[17].mxu1 }
 0x11d   : > { %651 = vst.msk [vmem:[%s1319_s29 + $0x38] sm:$0xff] %vm305_vm0, %v601_v54  ;;  %v673_v1 = vsel %vm305_vm0, %v601_v54, 0.0  ;;  %v706_v2 = vmul.f32 %v601_v54, %v601_v54  ;;  %v726_v3 = vsel %vm305_vm0, %v705_v57, 0.0  ;;  %v944_v4 = vadd.f32 %v943_v63, %v942_v58 }
 0x11e   : > { %v727_v5 = vadd.f32 %v726_v3, %v725_v62  ;;  %v674_v6 = vadd.f32 %v673_v1, %v672_v60 }
 0x11f   : > { %v728_v7 = vsel %vm305_vm0, %v706_v2, 0.0  ;;  %v606_v8 = vadd.f32 %v944_v4, %v605_v0  ;;  %v945_v9 = vpop.f32.mrb[18].mxu0  ;;  %v1011_v10 = vpop.f32.mrb[18].mxu1 }
 0x120   : > { %v729_v11 = vadd.f32 %v728_v7, %v727_v5  ;;  %v946_v12 = vpop.f32.mrb[19].mxu0  ;;  %v615_v13 = vpop.f32.mrb[19].mxu1 }
 0x121   : > { %652 = vst.msk [vmem:[%s1319_s29 + $0x40] sm:$0xff] %vm305_vm0, %v606_v8  ;;  %v675_v14 = vsel %vm305_vm0, %v606_v8, 0.0  ;;  %v707_v15 = vmul.f32 %v606_v8, %v606_v8  ;;  %v947_v16 = vadd.f32 %v946_v12, %v945_v9 }
 0x122   : > { %v676_v17 = vadd.f32 %v675_v14, %v674_v6 }
 0x123   : > { %v730_v18 = vsel %vm305_vm0, %v707_v15, 0.0  ;;  %v611_v19 = vadd.f32 %v1008_v59, %v947_v16  ;;  %v948_v20 = vpop.f32.mrb[20].mxu0  ;;  %v1014_v21 = vpop.f32.mrb[20].mxu1 }
 0x124   : > { %v731_v22 = vadd.f32 %v730_v18, %v729_v11  ;;  %v631_v23 = vadd.f32 %v1014_v21, %v1309_v49  ;;  %v949_v24 = vpop.f32.mrb[21].mxu0  ;;  %v625_v25 = vpop.f32.mrb[21].mxu1 }
 0x125   : > { %653 = vst.msk [vmem:[%s1319_s29 + $0x48] sm:$0xff] %vm305_vm0, %v611_v19  ;;  %v677_v26 = vsel %vm305_vm0, %v611_v19, 0.0  ;;  %v708_v27 = vmul.f32 %v611_v19, %v611_v19  ;;  %v950_v28 = vadd.f32 %v949_v24, %v948_v20  ;;  %v626_v29 = vadd.f32 %v1307_v43, %v625_v25 }
 0x126   : > { %v678_v30 = vadd.f32 %v677_v26, %v676_v17  ;;  %657 = vst.msk [vmem:[%s1319_s29 + $0x68] sm:$0xff] %vm305_vm0, %v631_v23  ;;  %v712_v50 = vmul.f32 %v631_v23, %v631_v23  ;;  %v685_v54 = vsel %vm305_vm0, %v631_v23, 0.0 }
 0x127   : > { %v732_v31 = vsel %vm305_vm0, %v708_v27, 0.0  ;;  %v616_v32 = vadd.f32 %v950_v28, %v615_v13  ;;  %656 = vst.msk [vmem:[%s1319_s29 + $0x60] sm:$0xff] %vm305_vm0, %v626_v29  ;;  %v951_v49 = vpop.f32.mrb[22].mxu0  ;;  %v1017_v33 = vpop.f32.mrb[22].mxu1  ;;  %v683_v51 = vsel %vm305_vm0, %v626_v29, 0.0 }
 0x128   : > { %v733_v34 = vadd.f32 %v732_v31, %v731_v22  ;;  %v641_v35 = vadd.f32 %v1017_v33, %v1314_v61  ;;  %v952_v36 = vpop.f32.mrb[23].mxu0  ;;  %v635_v37 = vpop.f32.mrb[23].mxu1  ;;  %v711_v61 = vmul.f32 %v626_v29, %v626_v29  ;;  %v740_v60 = vsel %vm305_vm0, %v712_v50, 0.0 }
 0x129   : > { %654 = vst.msk [vmem:[%s1319_s29 + $0x50] sm:$0xff] %vm305_vm0, %v616_v32  ;;  %v679_v43 = vsel %vm305_vm0, %v616_v32, 0.0  ;;  %v709_v38 = vmul.f32 %v616_v32, %v616_v32  ;;  %v953_v39 = vadd.f32 %v952_v36, %v951_v49  ;;  %v636_v41 = vadd.f32 %v1311_v55, %v635_v37 }
 0x12a   : > { %v680_v40 = vadd.f32 %v679_v43, %v678_v30  ;;  %659 = vst.msk [vmem:[%s1319_s29 + $0x78] sm:$0xff] %vm305_vm0, %v641_v35  ;;  %v738_v56 = vsel %vm305_vm0, %v711_v61, 0.0  ;;  %v714_v62 = vmul.f32 %v641_v35, %v641_v35  ;;  %v689_v2 = vsel %vm305_vm0, %v641_v35, 0.0 }
 0x12b   : > { %v734_v42 = vsel %vm305_vm0, %v709_v38, 0.0  ;;  %v621_v44 = vadd.f32 %v1011_v10, %v953_v39  ;;  %658 = vst.msk [vmem:[%s1319_s29 + $0x70] sm:$0xff] %vm305_vm0, %v636_v41  ;;  %v713_v57 = vmul.f32 %v636_v41, %v636_v41  ;;  %v687_v63 = vsel %vm305_vm0, %v636_v41, 0.0 }
 0x12c   : > { %v735_v45 = vadd.f32 %v734_v42, %v733_v34  ;;  %v744_v6 = vsel %vm305_vm0, %v714_v62, 0.0 }
 0x12d   : > { %655 = vst.msk [vmem:[%s1319_s29 + $0x58] sm:$0xff] %vm305_vm0, %v621_v44  ;;  %v681_v46 = vsel %vm305_vm0, %v621_v44, 0.0  ;;  %v710_v47 = vmul.f32 %v621_v44, %v621_v44  ;;  %v742_v3 = vsel %vm305_vm0, %v713_v57, 0.0 }
 0x12e   : > { %v682_v48 = vadd.f32 %v681_v46, %v680_v40 }
 0x12f   : > { %v736_v52 = vsel %vm305_vm0, %v710_v47, 0.0 }
 0x130   : > { %v737_v53 = vadd.f32 %v736_v52, %v735_v45  ;;  %v684_v55 = vadd.f32 %v683_v51, %v682_v48 }
 0x132   : > { %v686_v58 = vadd.f32 %v685_v54, %v684_v55  ;;  %v739_v59 = vadd.f32 %v738_v56, %v737_v53 }
 0x134   : > { %v688_v0 = vadd.f32 %v687_v63, %v686_v58  ;;  %v741_v1 = vadd.f32 %v740_v60, %v739_v59 }
 0x136   : > { %v690_v4 = vadd.f32 %v689_v2, %v688_v0  ;;  %v743_v5 = vadd.f32 %v742_v3, %v741_v1 }
 0x138   : > { %v691_v7 = vrot.slane %v690_v4, 4  ;;  %v745_v8 = vadd.f32 %v744_v6, %v743_v5 }
 0x13a   : > { %v692_v9 = vadd.f32 %v691_v7, %v690_v4  ;;  %v746_v10 = vrot.slane %v745_v8, 4 }
 0x13c   : > { %v693_v11 = vrot.slane %v692_v9, 2  ;;  %v747_v12 = vadd.f32 %v746_v10, %v745_v8 }
 0x13e   : > { %v694_v13 = vadd.f32 %v693_v11, %v692_v9  ;;  %v748_v14 = vrot.slane %v747_v12, 2 }
 0x140   : > { %v695_v15 = vrot.slane %v694_v13, 1  ;;  %v749_v16 = vadd.f32 %v748_v14, %v747_v12 }
 0x142   : > { %v696_v17 = vadd.f32 %v695_v15, %v694_v13  ;;  %v750_v18 = vrot.slane %v749_v16, 1 }
 0x144   : > { %698 = vst.msk [vmem:[%s217_s5] sm:$0x1] %vm697_vm1, %v696_v17  ;;  %v751_v19 = vadd.f32 %v750_v18, %v749_v16 }
 0x146   : > { %752 = vst.msk [vmem:[%s220_s8] sm:$0x1] %vm697_vm1, %v751_v19 }
 0x147 PF: > { %s15_s15 = sadd.s32 1, %s1089_s15  }
 0x148   : > { %p12_p5 = scmp.ge.s32.totalorder %s15_s15, 6  }
 0x14a   :  { %14 = sbr.rel (!%p12_p5) target bundleno = 1 (0x1), region = 82 }

// kernel: basic_block_forward.5
= control target key start
LH: loop header
LB: loop body
LE: loop exit
PB: predicated region body
PF: predicated region fallthrough
CT: control target
= control target key end

     0   :  { %s254_s0 = inlined_call_operand.vmem [shape: f32[128,128], index: 0, kind: input, shape index: {}]   ;;  %s255_s1 = inlined_call_operand.vmem [shape: f32[1,128], index: 1, kind: input, shape index: {}]   ;;  %s256_s2 = inlined_call_operand.vmem [shape: f32[1,128], index: 2, kind: input, shape index: {}]   ;;  %s257_s3 = inlined_call_operand.vmem [shape: f32[128,128], index: 3, kind: output, shape index: {}]  }
   0x1   :  { %v14_v0 = vld [vmem:[%s254_s0] sm:$0xff]  ;;  %v15_v4 = vld [vmem:[%s254_s0 + $0x8] sm:$0xff]  ;;  %v16_v5 = vld [vmem:[%s254_s0 + $0x10] sm:$0xff] }
   0x2   :  { %v112_v1 = vld [vmem:[%s255_s1] ss:$0 sm:$0xff]  ;;  %v17_v6 = vld [vmem:[%s254_s0 + $0x18] sm:$0xff]  ;;  %v19_v11 = vld [vmem:[%s254_s0 + $0x28] sm:$0xff] }
   0x3   :  { %v143_v2 = vld [vmem:[%s256_s2] ss:$0 sm:$0xff]  ;;  %v37_v3 = vmul.f32 %v112_v1, %v14_v0  ;;  %v38_v7 = vmul.f32 %v112_v1, %v15_v4  ;;  %v39_v8 = vmul.f32 %v112_v1, %v16_v5  ;;  %v40_v9 = vmul.f32 %v112_v1, %v17_v6  ;;  %v20_v12 = vld [vmem:[%s254_s0 + $0x30] sm:$0xff]  ;;  %v21_v17 = vld [vmem:[%s254_s0 + $0x38] sm:$0xff] }
   0x4   :  { %v18_v10 = vld [vmem:[%s254_s0 + $0x20] sm:$0xff]  ;;  %v42_v15 = vmul.f32 %v112_v1, %v19_v11  ;;  %v43_v16 = vmul.f32 %v112_v1, %v20_v12  ;;  %v44_v21 = vmul.f32 %v112_v1, %v21_v17  ;;  %v23_v27 = vld [vmem:[%s254_s0 + $0x48] sm:$0xff]  ;;  %v24_v28 = vld [vmem:[%s254_s0 + $0x50] sm:$0xff] }
   0x5   :  { %v60_v13 = vadd.f32 %v143_v2, %v37_v3  ;;  %v41_v14 = vmul.f32 %v112_v1, %v18_v10  ;;  %v61_v18 = vadd.f32 %v143_v2, %v38_v7  ;;  %v62_v19 = vadd.f32 %v143_v2, %v39_v8  ;;  %v22_v22 = vld [vmem:[%s254_s0 + $0x40] sm:$0xff]  ;;  %v25_v29 = vld [vmem:[%s254_s0 + $0x58] sm:$0xff]  ;;  %v27_v35 = vld [vmem:[%s254_s0 + $0x68] sm:$0xff] }
   0x6   :  { %v63_v20 = vadd.f32 %v143_v2, %v40_v9  ;;  %v65_v25 = vadd.f32 %v143_v2, %v42_v15  ;;  %v66_v26 = vadd.f32 %v143_v2, %v43_v16  ;;  %v67_v33 = vadd.f32 %v143_v2, %v44_v21  ;;  %v26_v34 = vld [vmem:[%s254_s0 + $0x60] sm:$0xff]  ;;  %v28_v36 = vld [vmem:[%s254_s0 + $0x70] sm:$0xff]  ;;  %v29_v41 = vld [vmem:[%s254_s0 + $0x78] sm:$0xff] }
   0x7   :  { %v76_v23 = vmax.f32 %v60_v13, 0.0  ;;  %v64_v24 = vadd.f32 %v143_v2, %v41_v14  ;;  %v77_v30 = vmax.f32 %v61_v18, 0.0  ;;  %v78_v31 = vmax.f32 %v62_v19, 0.0 }
   0x8   :  { %v79_v32 = vmax.f32 %v63_v20, 0.0  ;;  %v81_v38 = vmax.f32 %v65_v25, 0.0  ;;  %v82_v39 = vmax.f32 %v66_v26, 0.0  ;;  %v45_v40 = vmul.f32 %v112_v1, %v22_v22 }
   0x9   :  { %92 = vst [vmem:[%s257_s3] sm:$0xff] %v76_v23  ;;  %v80_v37 = vmax.f32 %v64_v24, 0.0  ;;  %93 = vst [vmem:[%s257_s3 + $0x8] sm:$0xff] %v77_v30  ;;  %v83_v42 = vmax.f32 %v67_v33, 0.0  ;;  %v46_v43 = vmul.f32 %v112_v1, %v23_v27  ;;  %v47_v44 = vmul.f32 %v112_v1, %v24_v28 }
   0xa   :  { %94 = vst [vmem:[%s257_s3 + $0x10] sm:$0xff] %v78_v31  ;;  %95 = vst [vmem:[%s257_s3 + $0x18] sm:$0xff] %v79_v32  ;;  %v48_v45 = vmul.f32 %v112_v1, %v25_v29  ;;  %v68_v46 = vadd.f32 %v143_v2, %v45_v40  ;;  %v49_v47 = vmul.f32 %v112_v1, %v26_v34 }
   0xb   :  { %96 = vst [vmem:[%s257_s3 + $0x20] sm:$0xff] %v80_v37  ;;  %97 = vst [vmem:[%s257_s3 + $0x28] sm:$0xff] %v81_v38  ;;  %v50_v48 = vmul.f32 %v112_v1, %v27_v35  ;;  %v51_v49 = vmul.f32 %v112_v1, %v28_v36  ;;  %v69_v50 = vadd.f32 %v143_v2, %v46_v43 }
   0xc   :  { %98 = vst [vmem:[%s257_s3 + $0x30] sm:$0xff] %v82_v39  ;;  %99 = vst [vmem:[%s257_s3 + $0x38] sm:$0xff] %v83_v42  ;;  %v70_v51 = vadd.f32 %v143_v2, %v47_v44  ;;  %v71_v52 = vadd.f32 %v143_v2, %v48_v45  ;;  %v52_v53 = vmul.f32 %v112_v1, %v29_v41  ;;  %v84_v54 = vmax.f32 %v68_v46, 0.0 }
   0xd   :  { %v72_v55 = vadd.f32 %v143_v2, %v49_v47  ;;  %v73_v56 = vadd.f32 %v143_v2, %v50_v48  ;;  %v74_v57 = vadd.f32 %v143_v2, %v51_v49  ;;  %v85_v58 = vmax.f32 %v69_v50, 0.0 }
   0xe   :  { %v86_v59 = vmax.f32 %v70_v51, 0.0  ;;  %v87_v60 = vmax.f32 %v71_v52, 0.0  ;;  %v75_v61 = vadd.f32 %v143_v2, %v52_v53  ;;  %100 = vst [vmem:[%s257_s3 + $0x40] sm:$0xff] %v84_v54 }
   0xf   :  { %v88_v62 = vmax.f32 %v72_v55, 0.0  ;;  %v89_v63 = vmax.f32 %v73_v56, 0.0  ;;  %v90_v0 = vmax.f32 %v74_v57, 0.0  ;;  %101 = vst [vmem:[%s257_s3 + $0x48] sm:$0xff] %v85_v58 }
  0x10   :  { %102 = vst [vmem:[%s257_s3 + $0x50] sm:$0xff] %v86_v59  ;;  %103 = vst [vmem:[%s257_s3 + $0x58] sm:$0xff] %v87_v60  ;;  %v91_v1 = vmax.f32 %v75_v61, 0.0 }
  0x11   :  { %104 = vst [vmem:[%s257_s3 + $0x60] sm:$0xff] %v88_v62  ;;  %105 = vst [vmem:[%s257_s3 + $0x68] sm:$0xff] %v89_v63 }
  0x12   :  { %106 = vst [vmem:[%s257_s3 + $0x70] sm:$0xff] %v90_v0  ;;  %107 = vst [vmem:[%s257_s3 + $0x78] sm:$0xff] %v91_v1 }

// kernel: basic_block_forward.7
= control target key start
LH: loop header
LB: loop body
LE: loop exit
PB: predicated region body
PF: predicated region fallthrough
CT: control target
= control target key end

     0   :  { %s360_s0 = inlined_call_operand.vmem [shape: f32[128,128], index: 0, kind: input, shape index: {}]   ;;  %s361_s1 = inlined_call_operand.vmem [shape: f32[1,128], index: 1, kind: input, shape index: {}]   ;;  %s362_s2 = inlined_call_operand.vmem [shape: f32[1,128], index: 2, kind: input, shape index: {}]   ;;  %s363_s3 = inlined_call_operand.vmem [shape: f32[128,128], index: 3, kind: input, shape index: {}]   ;;  %s364_s4 = inlined_call_operand.vmem [shape: f32[128,128], index: 4, kind: output, shape index: {}]  }
   0x1   :  { %v17_v0 = vld [vmem:[%s360_s0] sm:$0xff]  ;;  %v18_v4 = vld [vmem:[%s360_s0 + $0x8] sm:$0xff]  ;;  %v19_v7 = vld [vmem:[%s360_s0 + $0x10] sm:$0xff] }
   0x2   :  { %v180_v1 = vld [vmem:[%s361_s1] ss:$0 sm:$0xff]  ;;  %v20_v8 = vld [vmem:[%s360_s0 + $0x18] sm:$0xff]  ;;  %v80_v10 = vld [vmem:[%s363_s3 + $0x8] sm:$0xff] }
   0x3   :  { %v185_v2 = vld [vmem:[%s362_s2] ss:$0 sm:$0xff]  ;;  %v40_v3 = vmul.f32 %v180_v1, %v17_v0  ;;  %v41_v6 = vmul.f32 %v180_v1, %v18_v4  ;;  %v42_v11 = vmul.f32 %v180_v1, %v19_v7  ;;  %v81_v12 = vld [vmem:[%s363_s3 + $0x10] sm:$0xff]  ;;  %v43_v13 = vmul.f32 %v180_v1, %v20_v8  ;;  %v82_v16 = vld [vmem:[%s363_s3 + $0x18] sm:$0xff] }
   0x4   :  { %v79_v5 = vld [vmem:[%s363_s3] sm:$0xff]  ;;  %v22_v18 = vld [vmem:[%s360_s0 + $0x28] sm:$0xff]  ;;  %v23_v19 = vld [vmem:[%s360_s0 + $0x30] sm:$0xff] }
   0x5   :  { %v63_v9 = vadd.f32 %v185_v2, %v40_v3  ;;  %v21_v14 = vld [vmem:[%s360_s0 + $0x20] sm:$0xff]  ;;  %v64_v15 = vadd.f32 %v185_v2, %v41_v6  ;;  %v65_v21 = vadd.f32 %v185_v2, %v42_v11  ;;  %v66_v22 = vadd.f32 %v185_v2, %v43_v13  ;;  %v24_v25 = vld [vmem:[%s360_s0 + $0x38] sm:$0xff]  ;;  %v84_v28 = vld [vmem:[%s363_s3 + $0x28] sm:$0xff] }
   0x6   :  { %v44_v17 = vmul.f32 %v180_v1, %v21_v14  ;;  %v83_v23 = vld [vmem:[%s363_s3 + $0x20] sm:$0xff]  ;;  %v45_v24 = vmul.f32 %v180_v1, %v22_v18  ;;  %v46_v29 = vmul.f32 %v180_v1, %v23_v19  ;;  %v47_v30 = vmul.f32 %v180_v1, %v24_v25  ;;  %v85_v36 = vld [vmem:[%s363_s3 + $0x30] sm:$0xff]  ;;  %v86_v37 = vld [vmem:[%s363_s3 + $0x38] sm:$0xff] }
   0x7   :  { %v95_v20 = vadd.f32 %v79_v5, %v63_v9  ;;  %v96_v26 = vadd.f32 %v80_v10, %v64_v15  ;;  %v25_v31 = vld [vmem:[%s360_s0 + $0x40] sm:$0xff]  ;;  %v97_v33 = vadd.f32 %v81_v12, %v65_v21  ;;  %v98_v34 = vadd.f32 %v82_v16, %v66_v22  ;;  %v26_v38 = vld [vmem:[%s360_s0 + $0x48] sm:$0xff]  ;;  %v27_v43 = vld [vmem:[%s360_s0 + $0x50] sm:$0xff] }
   0x8   :  { %v67_v27 = vadd.f32 %v185_v2, %v44_v17  ;;  %v68_v35 = vadd.f32 %v185_v2, %v45_v24  ;;  %v69_v41 = vadd.f32 %v185_v2, %v46_v29  ;;  %v70_v42 = vadd.f32 %v185_v2, %v47_v30  ;;  %v28_v44 = vld [vmem:[%s360_s0 + $0x58] sm:$0xff]  ;;  %v29_v49 = vld [vmem:[%s360_s0 + $0x60] sm:$0xff]  ;;  %v30_v55 = vld [vmem:[%s360_s0 + $0x68] sm:$0xff] }
   0x9   :  { %v111_v32 = vmax.f32 %v95_v20, 0.0  ;;  %v112_v39 = vmax.f32 %v96_v26, 0.0  ;;  %v113_v45 = vmax.f32 %v97_v33, 0.0  ;;  %v114_v46 = vmax.f32 %v98_v34, 0.0  ;;  %v87_v53 = vld [vmem:[%s363_s3 + $0x40] sm:$0xff]  ;;  %v88_v58 = vld [vmem:[%s363_s3 + $0x48] sm:$0xff] }
   0xa   :  { %v99_v40 = vadd.f32 %v83_v23, %v67_v27  ;;  %v100_v47 = vadd.f32 %v84_v28, %v68_v35  ;;  %v48_v48 = vmul.f32 %v180_v1, %v25_v31  ;;  %v101_v51 = vadd.f32 %v85_v36, %v69_v41  ;;  %v31_v61 = vld [vmem:[%s360_s0 + $0x70] sm:$0xff]  ;;  %v32_v62 = vld [vmem:[%s360_s0 + $0x78] sm:$0xff]  ;;  %v91_v10 = vld [vmem:[%s363_s3 + $0x60] sm:$0xff] }
   0xb   :  { %127 = vst [vmem:[%s364_s4] sm:$0xff] %v111_v32  ;;  %128 = vst [vmem:[%s364_s4 + $0x8] sm:$0xff] %v112_v39  ;;  %v102_v52 = vadd.f32 %v86_v37, %v70_v42  ;;  %v49_v54 = vmul.f32 %v180_v1, %v26_v38  ;;  %v50_v59 = vmul.f32 %v180_v1, %v27_v43  ;;  %v89_v4 = vld [vmem:[%s363_s3 + $0x50] sm:$0xff]  ;;  %v90_v5 = vld [vmem:[%s363_s3 + $0x58] sm:$0xff] }
   0xc   :  { %v115_v50 = vmax.f32 %v99_v40, 0.0  ;;  %129 = vst [vmem:[%s364_s4 + $0x10] sm:$0xff] %v113_v45  ;;  %130 = vst [vmem:[%s364_s4 + $0x18] sm:$0xff] %v114_v46  ;;  %v116_v56 = vmax.f32 %v100_v47, 0.0  ;;  %v71_v57 = vadd.f32 %v185_v2, %v48_v48  ;;  %v51_v60 = vmul.f32 %v180_v1, %v28_v44  ;;  %v92_v14 = vld [vmem:[%s363_s3 + $0x68] sm:$0xff]  ;;  %v93_v21 = vld [vmem:[%s363_s3 + $0x70] sm:$0xff] }
   0xd   :  { %v117_v63 = vmax.f32 %v101_v51, 0.0  ;;  %v118_v0 = vmax.f32 %v102_v52, 0.0  ;;  %v72_v3 = vadd.f32 %v185_v2, %v49_v54  ;;  %v52_v6 = vmul.f32 %v180_v1, %v29_v49  ;;  %v94_v22 = vld [vmem:[%s363_s3 + $0x78] sm:$0xff] }
   0xe   :  { %131 = vst [vmem:[%s364_s4 + $0x20] sm:$0xff] %v115_v50  ;;  %132 = vst [vmem:[%s364_s4 + $0x28] sm:$0xff] %v116_v56  ;;  %v103_v7 = vadd.f32 %v87_v53, %v71_v57  ;;  %v73_v8 = vadd.f32 %v185_v2, %v50_v59  ;;  %v74_v9 = vadd.f32 %v185_v2, %v51_v60 }
   0xf   :  { %v53_v11 = vmul.f32 %v180_v1, %v30_v55  ;;  %133 = vst [vmem:[%s364_s4 + $0x30] sm:$0xff] %v117_v63  ;;  %134 = vst [vmem:[%s364_s4 + $0x38] sm:$0xff] %v118_v0  ;;  %v104_v12 = vadd.f32 %v88_v58, %v72_v3  ;;  %v75_v13 = vadd.f32 %v185_v2, %v52_v6 }
  0x10   :  { %v54_v15 = vmul.f32 %v180_v1, %v31_v61  ;;  %v55_v16 = vmul.f32 %v180_v1, %v32_v62  ;;  %v119_v17 = vmax.f32 %v103_v7, 0.0  ;;  %v105_v18 = vadd.f32 %v89_v4, %v73_v8 }
  0x11   :  { %v106_v19 = vadd.f32 %v90_v5, %v74_v9  ;;  %v76_v20 = vadd.f32 %v185_v2, %v53_v11  ;;  %v120_v23 = vmax.f32 %v104_v12, 0.0  ;;  %v107_v24 = vadd.f32 %v91_v10, %v75_v13 }
  0x12   :  { %v77_v25 = vadd.f32 %v185_v2, %v54_v15  ;;  %v78_v26 = vadd.f32 %v185_v2, %v55_v16  ;;  %135 = vst [vmem:[%s364_s4 + $0x40] sm:$0xff] %v119_v17  ;;  %v121_v1 = vmax.f32 %v105_v18, 0.0 }
  0x13   :  { %v122_v27 = vmax.f32 %v106_v19, 0.0  ;;  %v108_v28 = vadd.f32 %v92_v14, %v76_v20  ;;  %136 = vst [vmem:[%s364_s4 + $0x48] sm:$0xff] %v120_v23  ;;  %v123_v29 = vmax.f32 %v107_v24, 0.0 }
  0x14   :  { %v109_v30 = vadd.f32 %v93_v21, %v77_v25  ;;  %v110_v31 = vadd.f32 %v94_v22, %v78_v26  ;;  %137 = vst [vmem:[%s364_s4 + $0x50] sm:$0xff] %v121_v1 }
  0x15   :  { %138 = vst [vmem:[%s364_s4 + $0x58] sm:$0xff] %v122_v27  ;;  %v124_v2 = vmax.f32 %v108_v28, 0.0  ;;  %139 = vst [vmem:[%s364_s4 + $0x60] sm:$0xff] %v123_v29 }
  0x16   :  { %v125_v32 = vmax.f32 %v109_v30, 0.0  ;;  %v126_v33 = vmax.f32 %v110_v31, 0.0 }
  0x17   :  { %140 = vst [vmem:[%s364_s4 + $0x68] sm:$0xff] %v124_v2 }
  0x18   :  { %141 = vst [vmem:[%s364_s4 + $0x70] sm:$0xff] %v125_v32  ;;  %142 = vst [vmem:[%s364_s4 + $0x78] sm:$0xff] %v126_v33 }

</bundles_post_ra>
